<compile_context>
chip_gen: v5e
topology: v5e:2x2
jax: 0.10.0
libtpu: 0.0.40
codegen_flags: <defaults>
</compile_context>

<pallas_src>
import jax
import jax.numpy as jnp
from jax.experimental import pallas as pl
from jax.experimental.pallas import tpu as pltpu

_LANES = 128          # vreg lane width: last dim maps here
_SUBLANES = 8         # vreg sublane count: second-last dim maps here
_TILE_ROWS = 1024     # (1024,128) f32 tile = 512 KiB; ~2 MiB double-buffered in+out
_SMALL_N = 2048       # below this, a fused XLA sigmoid beats any kernel launch


def _round_up(a, b):
    return ((a + b - 1) // b) * b


def _sigmoid_kernel(x_ref, o_ref):
    # Load in the stored dtype, compute in f32 vregs (portable to v5e which
    # has no bf16 VPU/EUP math), cast back on store.  Exact math: the kernel
    # is DMA/store-limited, so an exact divide is free relative to HBM traffic.
    x = x_ref[...].astype(jnp.float32)
    y = 1.0 / (1.0 + jnp.exp(-x))          # exp on EUP, exact divide
    o_ref[...] = y.astype(o_ref.dtype)


def _sigmoid_pallas_2d(x2d):
    """x2d: (R, 128) with R % 8 == 0, any float dtype."""
    R, L = x2d.shape
    tile_rows = min(_TILE_ROWS, R)          # R is sublane-aligned by the wrapper
    grid = (pl.cdiv(R, tile_rows),)
    return pl.pallas_call(
        _sigmoid_kernel,
        out_shape=jax.ShapeDtypeStruct((R, L), x2d.dtype),
        grid=grid,
        in_specs=[pl.BlockSpec((tile_rows, L), lambda i: (i, 0))],
        out_specs=pl.BlockSpec((tile_rows, L), lambda i: (i, 0)),
        compiler_params=pltpu.CompilerParams(
            dimension_semantics=("parallel",)),   # v7x: shard rows across 2 TCs
    )(x2d)


class PredictionLayer:
    """JAX/Pallas equivalent of the PyTorch PredictionLayer."""

    def __init__(self, task_type='classification'):
        if task_type not in ['classification', 'regression']:
            raise ValueError('task_type must be classification or regression')
        self.task_type = task_type

    def __call__(self, x):
        if self.task_type == 'regression':
            return x  # identity — nothing to compute

        x = jnp.asarray(x)
        if not jnp.issubdtype(x.dtype, jnp.floating):
            x = x.astype(jnp.float32)

        # Small-input fast path: kernel launch + layout plumbing would be
        # pure overhead for the typical (batch, 1) logits.
        if x.size < _SMALL_N:
            return jax.nn.sigmoid(x)

        orig_shape = x.shape
        xf = x.reshape(-1)                          # free for contiguous arrays
        n = xf.shape[0]
        n_pad = _round_up(n, _SUBLANES * _LANES)    # align rows to sublanes too
        padded = n_pad != n
        if padded:
            xf = jnp.pad(xf, (0, n_pad - n))        # pads <= 1023 elements
        x2d = xf.reshape(n_pad // _LANES, _LANES)   # row-major: no copy
        y2d = _sigmoid_pallas_2d(x2d)
        y = y2d.reshape(-1)
        if padded:
            y = y[:n]
        return y.reshape(orig_shape)


if __name__ == "__main__":
    key = jax.random.PRNGKey(0)
    k1, k2, k3 = jax.random.split(key, 3)

    layer_cls = PredictionLayer('classification')
    layer_reg = PredictionLayer('regression')

    # 1) Small f32 logits, exercises the Pallas kernel (8192 elems -> (64,128)).
    x_f32 = jax.random.normal(k1, (256, 32), dtype=jnp.float32)
    y_f32 = jax.block_until_ready(layer_cls(x_f32))
    assert jnp.allclose(y_f32, jax.nn.sigmoid(x_f32), atol=1e-5, rtol=1e-5), \
        "f32 kernel path mismatch vs reference"

    # 2) Ragged size (n % 1024 != 0) + native bf16 DMA through the kernel.
    x_bf = jax.random.normal(k2, (100, 33), dtype=jnp.bfloat16)
    y_bf = jax.block_until_ready(layer_cls(x_bf))
    ref_bf = jax.nn.sigmoid(x_bf.astype(jnp.float32)).astype(jnp.bfloat16)
    assert y_bf.dtype == jnp.bfloat16
    assert jnp.allclose(y_bf.astype(jnp.float32), ref_bf.astype(jnp.float32),
                        atol=1e-2, rtol=1e-2), "bf16 kernel path mismatch vs reference"

    # 3) Typical MDMTRec usage: (batch, 1) logits -> small-input fast path.
    x_small = jax.random.normal(k3, (16, 1), dtype=jnp.float32)
    y_small = jax.block_until_ready(layer_cls(x_small))
    assert jnp.allclose(y_small, jax.nn.sigmoid(x_small), atol=1e-6, rtol=1e-6), \
        "small-path mismatch vs reference"

    # 4) Regression path: identity.
    y_reg = jax.block_until_ready(layer_reg(x_f32))
    assert jnp.array_equal(y_reg, x_f32), "regression path must be identity"

    print("KERNEL_OK")
</pallas_src>

<mosaic_0001>
module attributes {stable_mosaic.version = 11 : i64} {
  func.func @_sigmoid_kernel(%arg0: i32, %arg1: memref<64x128xf32, #tpu.memory_space<vmem>>, %arg2: memref<64x128xf32, #tpu.memory_space<vmem>>) attributes {dimension_semantics = [#tpu.dimension_semantics<parallel>], iteration_bounds = array<i64: 1>, scalar_prefetch = 0 : i64, scratch_operands = 0 : i64, tpu.core_type = #tpu.core_type<tc>, window_params = [{transform_indices = @transform_0, window_bounds = array<i64: 64, 128>}, {transform_indices = @transform_1, window_bounds = array<i64: 64, 128>}]} {
    %c0 = arith.constant 0 : index
    %c0_0 = arith.constant 0 : index
    %0 = vector.load %arg1[%c0, %c0_0] : memref<64x128xf32, #tpu.memory_space<vmem>>, vector<64x128xf32>
    %cst = arith.constant 0.000000e+00 : f32
    %1 = vector.broadcast %cst : f32 to vector<64x128xf32>
    %2 = arith.subf %1, %0 : vector<64x128xf32>
    %3 = math.exp %2 : vector<64x128xf32>
    %cst_1 = arith.constant 1.000000e+00 : f32
    %4 = vector.broadcast %cst_1 : f32 to vector<64x128xf32>
    %5 = arith.addf %4, %3 : vector<64x128xf32>
    %cst_2 = arith.constant 1.000000e+00 : f32
    %6 = vector.broadcast %cst_2 : f32 to vector<64x128xf32>
    %7 = arith.divf %6, %5 : vector<64x128xf32>
    %c0_3 = arith.constant 0 : index
    %c0_4 = arith.constant 0 : index
    %8 = vector.load %arg2[%c0_3, %c0_4] : memref<64x128xf32, #tpu.memory_space<vmem>>, vector<64x128xf32>
    tpu.vector_store %arg2[%c0_3, %c0_4], %7 {strides = array<i32>} : memref<64x128xf32, #tpu.memory_space<vmem>>, vector<64x128xf32>,
    return
  }
  func.func @transform_0(%arg0: i32) -> (i32, i32) {
    %c0_i32 = arith.constant 0 : i32
    %c0_i32_0 = arith.constant 0 : i32
    return %arg0, %c0_i32 : i32, i32
  }
  func.func @transform_1(%arg0: i32) -> (i32, i32) {
    %c0_i32 = arith.constant 0 : i32
    %c0_i32_0 = arith.constant 0 : i32
    return %arg0, %c0_i32 : i32, i32
  }
}

</mosaic_0001>

<bundles_post_ra>
// kernel: tpu_custom_call.1
= control target key start
LH: loop header
LB: loop body
LE: loop exit
PB: predicated region body
PF: predicated region fallthrough
CT: control target
= control target key end

     0   :  { %6 = vsyncpa [#allocation3], 0  ;;  %s438_s0 = inlined_call_operand.hbm [shape: f32[64,128], index: 0, kind: input, shape index: {}]   ;;  %s439_s1 = inlined_call_operand.hbm [shape: f32[64,128], index: 1, kind: output, shape index: {}]  }
   0x1   :  { %7 = vsyncpa [#allocation4], 0  ;;  %s12_s8 = sshll.u32 %s438_s0, 4  ;;  %s300_s9 = smov [#allocation2]   ;;  %s13_s8 = int_to_ptr.hbm [resolvable:$true] %s12_s8 }
   0x2   :  { %s14_s10 = sshll.u32 %s300_s9, 4  ;;  %s301_s11 = smov 128   ;;  %s15_s10 = int_to_ptr.vmem [resolvable:$true] %s14_s10 }
   0x3   :  { %s302_s12 = smov 8  }
   0x4   :  { %20 = dma.hbm_to_vmem [thread:$0]  %s13_s8, 1024, %s15_s10, [#allocation3], %s301_s11, %s301_s11, %s302_s12  }
   0x5   :  { %296 = dma.done.wait [#allocation3], 1024  }
   0x6   :  { %297 = vsyncadd [#allocation3], 4294966272  ;;  %v25_v0 = vld [vmem:[#allocation2] sm:$0xff]  ;;  %v26_v1 = vld [vmem:[#allocation2 + $0x8] sm:$0xff]  ;;  %s303_s0 = smov [#allocation5]   ;;  %s199_s16 = sshll.u32 %s439_s1, 4  ;;  %s200_s16 = int_to_ptr.hbm [resolvable:$true] %s199_s16 }
   0x7   :  { %v27_v2 = vld [vmem:[#allocation2 + $0x10] sm:$0xff]  ;;  %v33_v3 = vsub.f32 0.0, %v25_v0  ;;  %v34_v4 = vsub.f32 0.0, %v26_v1  ;;  %v28_v6 = vld [vmem:[#allocation2 + $0x18] sm:$0xff]  ;;  %v29_v7 = vld [vmem:[#allocation2 + $0x20] sm:$0xff]  ;;  %s197_s13 = sshll.u32 %s303_s0, 4  ;;  %s198_s13 = int_to_ptr.vmem [resolvable:$true] %s197_s13 }
   0x8   :  { %v35_v5 = vsub.f32 0.0, %v27_v2  ;;  %v30_v8 = vld [vmem:[#allocation2 + $0x28] sm:$0xff]  ;;  %v36_v9 = vsub.f32 0.0, %v28_v6  ;;  %v37_v10 = vsub.f32 0.0, %v29_v7  ;;  %v31_v17 = vld [vmem:[#allocation2 + $0x30] sm:$0xff]  ;;  %v32_v19 = vld [vmem:[#allocation2 + $0x38] sm:$0xff] }
   0x9   :  { %v38_v11 = vsub.f32 0.0, %v30_v8  ;;  %v41_v12 = vmul.f32 1.442695, %v33_v3  ;;  %v43_v13 = vmul.f32 1.442695, %v34_v4  ;;  %v39_v20 = vsub.f32 0.0, %v31_v17 }
   0xa   :  { %v45_v14 = vmul.f32 1.442695, %v35_v5  ;;  %v47_v15 = vmul.f32 1.442695, %v36_v9  ;;  %v49_v16 = vmul.f32 1.442695, %v37_v10 }
   0xb   :  { %216 = vpow2.f32 %v41_v12  ;;  %v51_v18 = vmul.f32 1.442695, %v38_v11  ;;  %v40_v21 = vsub.f32 0.0, %v32_v19  ;;  %v53_v25 = vmul.f32 1.442695, %v39_v20 }
   0xc   :  { %218 = vpow2.f32 %v43_v13 }
   0xd   :  { %220 = vpow2.f32 %v45_v14  ;;  %v55_v28 = vmul.f32 1.442695, %v40_v21 }
   0xe   :  { %222 = vpow2.f32 %v47_v15 }
   0xf   :  { %224 = vpow2.f32 %v49_v16 }
  0x10   :  { %226 = vpow2.f32 %v51_v18 }
  0x11   :  { %v217_v22 = vpop.eup %216 }
  0x12   :  { %v219_v23 = vpop.eup %218  ;;  %v57_v24 = vadd.f32 1.0, %v217_v22 }
  0x13   :  { %v221_v26 = vpop.eup %220  ;;  %v320_v27 = vadd.f32 1.0, %v219_v23 }
  0x14   :  { %v223_v29 = vpop.eup %222  ;;  %228 = vrcp.f32 %v57_v24  ;;  %v74_v31 = vand.u32 2147483647, %v57_v24  ;;  %v76_v33 = vand.u32 2147483648, %v57_v24  ;;  %v323_v34 = vadd.f32 1.0, %v221_v26 }
  0x15   :  { %v225_v30 = vpop.eup %224  ;;  %230 = vrcp.f32 %v320_v27  ;;  %v325_v35 = vadd.f32 1.0, %v223_v29  ;;  %v89_v36 = vand.u32 2147483647, %v320_v27  ;;  %v91_v37 = vand.u32 2147483648, %v320_v27 }
  0x16   :  { %v227_v32 = vpop.eup %226  ;;  %232 = vpow2.f32 %v53_v25  ;;  %v329_v38 = vadd.f32 1.0, %v225_v30  ;;  %vm70_vm0 = vweird.f32 %v57_v24  ;;  %vm85_vm1 = vweird.f32 %v320_v27 }
  0x17   :  { %234 = vpow2.f32 %v55_v28  ;;  %v106_v39 = vand.u32 2147483648, %v323_v34  ;;  %vm334_vm2 = vcmp.eq.f32.partialorder %v74_v31, 8.507059e+37  ;;  %v104_v41 = vand.u32 2147483647, %v323_v34 }
  0x18   :  { %236 = vrcp.f32 %v323_v34  ;;  %v340_v42 = vadd.f32 1.0, %v227_v32  ;;  %v77_v44 = vor.u32 1.1754944e-38, %v76_v33  ;;  %v119_v45 = vand.u32 2147483647, %v325_v35 }
  0x19   :  { %238 = vrcp.f32 %v325_v35  ;;  %v121_v46 = vand.u32 2147483648, %v325_v35  ;;  %vm345_vm3 = vcmp.eq.f32.partialorder %v89_v36, 8.507059e+37  ;;  %v92_v50 = vor.u32 1.1754944e-38, %v91_v37 }
  0x1a   :  { %v229_v43 = vpop.eup %228  ;;  %240 = vrcp.f32 %v329_v38  ;;  %vm100_vm4 = vweird.f32 %v323_v34  ;;  %v107_v53 = vor.u32 1.1754944e-38, %v106_v39  ;;  %vm115_vm5 = vweird.f32 %v325_v35 }
  0x1b   :  { %v231_v47 = vpop.eup %230  ;;  %v66_v48 = vmul.f32 %v229_v43, %v57_v24  ;;  %v136_v54 = vand.u32 2147483648, %v329_v38  ;;  %vm71_vm6 = vweird.f32 %v229_v43  ;;  %vm353_vm7 = vcmp.eq.f32.partialorder %v104_v41, 8.507059e+37 }
  0x1c   :  { %v233_v51 = vpop.eup %232  ;;  %v81_v52 = vmul.f32 %v231_v47, %v320_v27  ;;  %vm130_vm8 = vweird.f32 %v329_v38  ;;  %242 = vrcp.f32 %v340_v42  ;;  %vm86_vm9 = vweird.f32 %v231_v47  ;;  %vm369_vm12 = vmor %vm70_vm0, %vm71_vm6 }
  0x1d   :  { %v235_v55 = vpop.eup %234  ;;  %v67_v56 = vsub.f32 1.0, %v66_v48  ;;  %vm359_vm10 = vcmp.eq.f32.partialorder %v119_v45, 8.507059e+37  ;;  %v122_v61 = vor.u32 1.1754944e-38, %v121_v46  ;;  %v134_v62 = vand.u32 2147483647, %v329_v38  ;;  %vm377_vm14 = vmor %vm85_vm1, %vm86_vm9 }
  0x1e   :  { %v237_v58 = vpop.eup %236  ;;  %v82_v59 = vsub.f32 1.0, %v81_v52  ;;  %vm145_vm11 = vweird.f32 %v340_v42  ;;  %v149_v2 = vand.u32 2147483647, %v340_v42  ;;  %v137_v7 = vor.u32 1.1754944e-38, %v136_v54 }
  0x1f   :  { %v239_v63 = vpop.eup %238  ;;  %v68_v0 = vmul.f32 %v229_v43, %v67_v56  ;;  %v96_v1 = vmul.f32 %v237_v58, %v323_v34  ;;  %vm101_vm13 = vweird.f32 %v237_v58  ;;  %v63_v14 = vadd.f32 1.0, %v233_v51 }
  0x20   :  { %v241_v3 = vpop.eup %240  ;;  %v83_v5 = vmul.f32 %v231_v47, %v82_v59  ;;  %v111_v6 = vmul.f32 %v239_v63, %v325_v35  ;;  %vm116_vm15 = vweird.f32 %v239_v63  ;;  %v384_v19 = vadd.f32 1.0, %v235_v55  ;;  %vm393_vm1 = vmor %vm100_vm4, %vm101_vm13 }
  0x21   :  { %v69_v8 = vadd.f32 %v229_v43, %v68_v0  ;;  %v97_v10 = vsub.f32 1.0, %v96_v1  ;;  %v126_v11 = vmul.f32 %v241_v3, %v329_v38  ;;  %vm131_vm0 = vweird.f32 %v241_v3 }
  0x22   :  { %v84_v12 = vadd.f32 %v231_v47, %v83_v5  ;;  %v112_v13 = vsub.f32 1.0, %v111_v6  ;;  %v243_v15 = vpop.eup %242  ;;  %v151_v29 = vand.u32 2147483648, %v340_v42  ;;  %vm411_vm4 = vmor %vm130_vm8, %vm131_vm0  ;;  %244 = vrcp.f32 %v63_v14 }
  0x23   :  { %v73_v16 = vsel %vm369_vm12, %v229_v43, %v69_v8  ;;  %v98_v17 = vmul.f32 %v237_v58, %v97_v10  ;;  %v127_v18 = vsub.f32 1.0, %v126_v11  ;;  %v141_v24 = vmul.f32 %v243_v15, %v340_v42 }
  0x24   :  { %v78_v20 = vsel %vm334_vm2, %v77_v44, %v73_v16  ;;  %v88_v21 = vsel %vm377_vm14, %v231_v47, %v84_v12  ;;  %v113_v23 = vmul.f32 %v239_v63, %v112_v13  ;;  %vm403_vm2 = vmor %vm115_vm5, %vm116_vm15  ;;  %vm135_vm5 = vcmp.eq.f32.partialorder %v134_v62, 8.507059e+37 }
  0x25   :  { %185 = vst [vmem:[#allocation5] sm:$0xff] %v78_v20  ;;  %v93_v25 = vsel %vm345_vm3, %v92_v50, %v88_v21  ;;  %v99_v26 = vadd.f32 %v237_v58, %v98_v17  ;;  %v128_v28 = vmul.f32 %v241_v3, %v127_v18  ;;  %v142_v32 = vsub.f32 1.0, %v141_v24 }
  0x26   :  { %186 = vst [vmem:[#allocation5 + $0x8] sm:$0xff] %v93_v25  ;;  %v114_v30 = vadd.f32 %v239_v63, %v113_v23  ;;  %vm146_vm3 = vweird.f32 %v243_v15  ;;  %246 = vrcp.f32 %v384_v19  ;;  %v152_v40 = vor.u32 1.1754944e-38, %v151_v29 }
  0x27   :  { %v103_v33 = vsel %vm393_vm1, %v237_v58, %v99_v26  ;;  %v129_v34 = vadd.f32 %v241_v3, %v128_v28  ;;  %v143_v37 = vmul.f32 %v243_v15, %v142_v32  ;;  %vm147_vm6 = vmor %vm145_vm11, %vm146_vm3  ;;  %vm160_vm8 = vweird.f32 %v63_v14 }
  0x28   :  { %v108_v35 = vsel %vm353_vm7, %v107_v53, %v103_v33  ;;  %v118_v36 = vsel %vm403_vm2, %v239_v63, %v114_v30  ;;  %vm150_vm7 = vcmp.eq.f32.partialorder %v149_v2, 8.507059e+37  ;;  %v245_v44 = vpop.eup %244  ;;  %v166_v49 = vand.u32 2147483648, %v63_v14 }
  0x29   :  { %187 = vst [vmem:[#allocation5 + $0x10] sm:$0xff] %v108_v35  ;;  %v123_v38 = vsel %vm359_vm10, %v122_v61, %v118_v36  ;;  %v133_v39 = vsel %vm411_vm4, %v241_v3, %v129_v34  ;;  %v144_v43 = vadd.f32 %v243_v15, %v143_v37  ;;  %v156_v47 = vmul.f32 %v245_v44, %v63_v14 }
  0x2a   :  { %188 = vst [vmem:[#allocation5 + $0x18] sm:$0xff] %v123_v38  ;;  %v138_v41 = vsel %vm135_vm5, %v137_v7, %v133_v39  ;;  %vm161_vm9 = vweird.f32 %v245_v44  ;;  %v164_v51 = vand.u32 2147483647, %v63_v14  ;;  %vm175_vm10 = vweird.f32 %v384_v19 }
  0x2b   :  { %189 = vst [vmem:[#allocation5 + $0x20] sm:$0xff] %v138_v41  ;;  %v148_v45 = vsel %vm147_vm6, %v243_v15, %v144_v43  ;;  %v157_v50 = vsub.f32 1.0, %v156_v47  ;;  %v181_v52 = vand.u32 2147483648, %v384_v19  ;;  %v179_v55 = vand.u32 2147483647, %v384_v19  ;;  %vm162_vm12 = vmor %vm160_vm8, %vm161_vm9 }
  0x2c   :  { %v153_v46 = vsel %vm150_vm7, %v152_v40, %v148_v45  ;;  %v247_v48 = vpop.eup %246  ;;  %v167_v56 = vor.u32 1.1754944e-38, %v166_v49  ;;  %vm165_vm13 = vcmp.eq.f32.partialorder %v164_v51, 8.507059e+37 }
  0x2d   :  { %190 = vst [vmem:[#allocation5 + $0x28] sm:$0xff] %v153_v46  ;;  %v171_v42 = vmul.f32 %v247_v48, %v384_v19  ;;  %v158_v53 = vmul.f32 %v245_v44, %v157_v50  ;;  %vm176_vm11 = vweird.f32 %v247_v48  ;;  %v182_v59 = vor.u32 1.1754944e-38, %v181_v52 }
  0x2e   :  { %vm177_vm14 = vmor %vm175_vm10, %vm176_vm11  ;;  %vm180_vm15 = vcmp.eq.f32.partialorder %v179_v55, 8.507059e+37 }
  0x2f   :  { %v172_v54 = vsub.f32 1.0, %v171_v42  ;;  %v159_v57 = vadd.f32 %v245_v44, %v158_v53 }
  0x31   :  { %v173_v58 = vmul.f32 %v247_v48, %v172_v54  ;;  %v163_v60 = vsel %vm162_vm12, %v245_v44, %v159_v57 }
  0x32   :  { %v168_v62 = vsel %vm165_vm13, %v167_v56, %v163_v60 }
  0x33   :  { %v174_v61 = vadd.f32 %v247_v48, %v173_v58  ;;  %191 = vst [vmem:[#allocation5 + $0x30] sm:$0xff] %v168_v62 }
  0x35   :  { %v178_v63 = vsel %vm177_vm14, %v247_v48, %v174_v61 }
  0x36   :  { %v183_v0 = vsel %vm180_vm15, %v182_v59, %v178_v63 }
  0x37   :  { %192 = vst [vmem:[#allocation5 + $0x38] sm:$0xff] %v183_v0 }
  0x38   :  { %205 = dma.vmem_to_hbm [thread:$0]  %s198_s13, 1024, %s200_s16, [#allocation4], %s301_s11, %s301_s11, %s302_s12  }
  0x39   :  { %298 = dma.done.wait [#allocation4], 1024  }
  0x3a   :  { %299 = vsyncadd [#allocation4], 4294966272 }
  0x3b   :  { %210 = vsyncpa [#allocation3], 1 }
  0x3c   :  { %211 = vsyncpa [#allocation4], 1 }

</bundles_post_ra>
